<compile_context>
chip_gen: v7x
topology: tpu7x:2x2x1
jax: 0.10.0
libtpu: 0.0.40
codegen_flags: <defaults>
</compile_context>

<pallas_src>
import math
import functools

import jax
import jax.numpy as jnp
from jax import lax
from jax.experimental import pallas as pl
from jax.experimental.pallas import tpu as pltpu


# ----------------------------------------------------------------------------
# Parameter / buffer construction (plain JAX glue — matches torch __init__)
# ----------------------------------------------------------------------------
def make_positional_encoding_table(d_model: int, max_len: int = 5000) -> jnp.ndarray:
    """Builds pe with shape (max_len, 1, d_model), identical to the torch buffer."""
    position = jnp.arange(0, max_len, dtype=jnp.float32)[:, None]            # (max_len, 1)
    div_term = jnp.exp(
        jnp.arange(0, d_model, 2, dtype=jnp.float32) * (-math.log(10000.0) / d_model)
    )                                                                         # (d_model//2,)
    angles = position * div_term                                              # (max_len, d_model//2)
    pe = jnp.zeros((max_len, d_model), dtype=jnp.float32)
    pe = pe.at[:, 0::2].set(jnp.sin(angles))
    pe = pe.at[:, 1::2].set(jnp.cos(angles))
    return pe[:, None, :]                                                     # (max_len, 1, d_model)


# ----------------------------------------------------------------------------
# Pallas kernels
# ----------------------------------------------------------------------------
def _pe_add_kernel(x_ref, pe_ref, o_ref):
    # Broadcasted elementwise add on the VPU. Compute in f32, store in x dtype
    # (lets callers feed bf16 activations and halve HBM traffic).
    o_ref[...] = (x_ref[...].astype(jnp.float32)
                  + pe_ref[...].astype(jnp.float32)).astype(o_ref.dtype)


def _pe_add_dropout_kernel(seed_ref, x_ref, pe_ref, o_ref, *, keep_prob, threshold):
    # Train mode: positional add followed by inverted dropout.
    # TODO(synk): RNG stream cannot bit-match torch.nn.Dropout; semantics
    # (Bernoulli(keep_prob) mask, scale by 1/keep_prob) are preserved.
    y = x_ref[...].astype(jnp.float32) + pe_ref[...].astype(jnp.float32)

    shape = x_ref.shape
    total = 1
    for d in shape:
        total *= d

    # Global flat element index => identical mask regardless of tiling or
    # which TensorCore a grid step lands on ("parallel" safe).
    idx = None
    stride = 1
    for axis in range(len(shape) - 1, -1, -1):
        term = lax.broadcasted_iota(jnp.uint32, shape, axis) * jnp.uint32(stride)
        idx = term if idx is None else idx + term
        stride *= shape[axis]
    base = pl.program_id(0).astype(jnp.uint32) * jnp.uint32(total % (1 << 32))

    # splitmix32-style mixing of (seed, element index); all-uint32 VPU math.
    h = (idx + base) ^ (seed_ref[0].astype(jnp.uint32) * jnp.uint32(0x9E3779B9))
    h = (h ^ (h >> 16)) * jnp.uint32(0x7FEB352D)
    h = (h ^ (h >> 15)) * jnp.uint32(0x846CA68B)
    h = h ^ (h >> 16)

    # threshold is pre-clamped to 2^32-1 (introduces a ~2^-32 keep-prob bias,
    # negligible). Unsigned compare -> no signed-MSB pitfalls.
    keep = (h < jnp.uint32(threshold)).astype(jnp.float32)
    o_ref[...] = (y * (keep * jnp.float32(1.0 / keep_prob))).astype(o_ref.dtype)


# ----------------------------------------------------------------------------
# Tiling helper
# ----------------------------------------------------------------------------
def _pick_block_rows(S, row_bytes, target_bytes=2 * 1024 * 1024):
    """Largest multiple of 8 so one x tile is ~target_bytes.

    Keeps double-buffered (x + pe + out) tiles well under the default scoped
    VMEM (32 MiB) on every generation including v7x's smaller 64 MiB VMEM,
    while giving the BlockSpec pipeline multiple grid steps for big arrays.
    """
    if S <= 8:
        return S
    rows = (target_bytes // max(row_bytes, 1)) // 8 * 8
    return int(max(8, min(rows, S)))


# ----------------------------------------------------------------------------
# Wrapper
# ----------------------------------------------------------------------------
def positional_encoding_forward(x, pe, *, dropout_p=0.1, training=False, seed=0,
                                block_rows=None, donate_x=False):
    """x: (S, B, D), pe: (max_len, 1, D) float32. Returns (S, B, D) in x.dtype."""
    S, B, D = x.shape

    if training and float(dropout_p) >= 1.0:
        return jnp.zeros_like(x)          # keep_prob == 0 edge case
    use_dropout = training and float(dropout_p) > 0.0

    # Lane-dense layout when the natural (s, B, D) blocks would waste lanes /
    # sublanes (D % 128 != 0 or B < 8).  Pre-tiling pe to (S, B*D) adds a
    # pe-sized read, so it's only taken on this small-B*D branch; with
    # 128-aligned D and B >= 8 we keep the 3-D broadcast layout.
    use_flat = (D % 128 != 0) or (B < 8)
    if use_flat:
        F = B * D
        x_in = x.reshape(S, F)                                   # free, contiguous
        pe_in = jnp.tile(pe[:S, 0, :], (1, B))                   # (S, F): b-major/d-minor
        row_bytes = F * x.dtype.itemsize
        bs = block_rows if block_rows is not None else _pick_block_rows(S, row_bytes)
        grid = (pl.cdiv(S, bs),)
        x_spec = pl.BlockSpec((bs, F), lambda i, *pf: (i, 0))
        pe_spec = pl.BlockSpec((bs, F), lambda i, *pf: (i, 0))
        out_spec = pl.BlockSpec((bs, F), lambda i, *pf: (i, 0))
        out_shape = jax.ShapeDtypeStruct((S, F), x.dtype)
    else:
        x_in = x
        pe_in = pe[:S]                                           # (S, 1, D)
        row_bytes = B * D * x.dtype.itemsize
        bs = block_rows if block_rows is not None else _pick_block_rows(S, row_bytes)
        grid = (pl.cdiv(S, bs),)
        x_spec = pl.BlockSpec((bs, B, D), lambda i, *pf: (i, 0, 0))
        pe_spec = pl.BlockSpec((bs, 1, D), lambda i, *pf: (i, 0, 0))
        out_spec = pl.BlockSpec((bs, B, D), lambda i, *pf: (i, 0, 0))
        out_shape = jax.ShapeDtypeStruct((S, B, D), x.dtype)

    # Tiles are fully independent -> "parallel" lets v7x shard the grid over
    # its two TensorCores (measured-neutral on v5e/v6e).
    cparams = pltpu.CompilerParams(dimension_semantics=("parallel",))

    if not use_dropout:
        out = pl.pallas_call(
            _pe_add_kernel,
            out_shape=out_shape,
            grid_spec=pltpu.PrefetchScalarGridSpec(
                num_scalar_prefetch=0,
                grid=grid,
                in_specs=[x_spec, pe_spec],
                out_specs=out_spec,
            ),
            compiler_params=cparams,
            input_output_aliases=({0: 0} if donate_x else {}),
        )(x_in, pe_in)
    else:
        keep_prob = 1.0 - float(dropout_p)
        threshold = min(int(round(keep_prob * (1 << 32))), (1 << 32) - 1)
        seed_arr = jnp.asarray([seed], dtype=jnp.int32)
        out = pl.pallas_call(
            functools.partial(_pe_add_dropout_kernel,
                              keep_prob=keep_prob, threshold=threshold),
            out_shape=out_shape,
            grid_spec=pltpu.PrefetchScalarGridSpec(
                num_scalar_prefetch=1,
                grid=grid,
                in_specs=[x_spec, pe_spec],
                out_specs=out_spec,
            ),
            compiler_params=cparams,
            input_output_aliases=({1: 0} if donate_x else {}),
        )(seed_arr, x_in, pe_in)

    return out.reshape(S, B, D)


# ----------------------------------------------------------------------------
# Demo / self-check
# ----------------------------------------------------------------------------
if __name__ == "__main__":
    S, B, D = 8, 2, 32          # seq=8, batch=2, d_model=32
    max_len = 64

    key = jax.random.PRNGKey(0)
    x = jax.random.normal(key, (S, B, D), dtype=jnp.float32)
    pe = make_positional_encoding_table(D, max_len=max_len)
    ref = x + pe[:S]            # (S,1,D) broadcast over batch

    # Eval mode: dropout is identity; just the broadcasted add.
    out = positional_encoding_forward(x, pe, dropout_p=0.1, training=False)
    out = jax.block_until_ready(out)
    assert out.shape == (S, B, D) and out.dtype == x.dtype
    assert jnp.allclose(out, ref, atol=1e-6, rtol=1e-6), "eval mismatch vs reference"

    # Train mode: surviving entries must equal ref / keep_prob, the rest are 0.
    keep_prob = 0.9
    out_tr = positional_encoding_forward(x, pe, dropout_p=0.1, training=True, seed=123)
    out_tr = jax.block_until_ready(out_tr)
    kept = out_tr != 0.0
    assert jnp.allclose(jnp.where(kept, out_tr, 0.0),
                        jnp.where(kept, ref / keep_prob, 0.0),
                        atol=1e-5, rtol=1e-5), "dropout scaling mismatch"
    frac = float(jnp.mean(kept.astype(jnp.float32)))
    assert 0.6 < frac <= 1.0, f"implausible keep fraction {frac}"

    # Exercise the multi-step pipelined path (grid > 1) at a slightly larger shape.
    S2, B2, D2 = 64, 4, 32
    x2 = jax.random.normal(jax.random.PRNGKey(1), (S2, B2, D2), dtype=jnp.float32)
    pe2 = make_positional_encoding_table(D2, max_len=128)
    out2 = positional_encoding_forward(x2, pe2, dropout_p=0.1, training=False,
                                       block_rows=16)           # grid = (4,)
    out2 = jax.block_until_ready(out2)
    assert jnp.allclose(out2, x2 + pe2[:S2], atol=1e-6, rtol=1e-6), "tiled path mismatch"

    print("KERNEL_OK")
</pallas_src>

<mosaic_0001>
module attributes {stable_mosaic.version = 11 : i64} {
  func.func @_pe_add_kernel(%arg0: i32, %arg1: memref<8x64xf32, #tpu.memory_space<vmem>>, %arg2: memref<8x64xf32, #tpu.memory_space<vmem>>, %arg3: memref<8x64xf32, #tpu.memory_space<vmem>>) attributes {dimension_semantics = [#tpu.dimension_semantics<parallel>], iteration_bounds = array<i64: 1>, scalar_prefetch = 0 : i64, scratch_operands = 0 : i64, tpu.core_type = #tpu.core_type<tc>, window_params = [{transform_indices = @transform_0, window_bounds = array<i64: 8, 64>}, {transform_indices = @transform_1, window_bounds = array<i64: 8, 64>}, {transform_indices = @transform_2, window_bounds = array<i64: 8, 64>}]} {
    %c0 = arith.constant 0 : index
    %c0_0 = arith.constant 0 : index
    %0 = vector.load %arg1[%c0, %c0_0] : memref<8x64xf32, #tpu.memory_space<vmem>>, vector<8x64xf32>
    %c0_1 = arith.constant 0 : index
    %c0_2 = arith.constant 0 : index
    %1 = vector.load %arg2[%c0_1, %c0_2] : memref<8x64xf32, #tpu.memory_space<vmem>>, vector<8x64xf32>
    %2 = arith.addf %0, %1 : vector<8x64xf32>
    %c0_3 = arith.constant 0 : index
    %c0_4 = arith.constant 0 : index
    %3 = vector.load %arg3[%c0_3, %c0_4] : memref<8x64xf32, #tpu.memory_space<vmem>>, vector<8x64xf32>
    tpu.vector_store %arg3[%c0_3, %c0_4], %2 {strides = array<i32>} : memref<8x64xf32, #tpu.memory_space<vmem>>, vector<8x64xf32>,
    return
  }
  func.func @transform_0(%arg0: i32) -> (i32, i32) {
    %c0_i32 = arith.constant 0 : i32
    %c0_i32_0 = arith.constant 0 : i32
    return %arg0, %c0_i32 : i32, i32
  }
  func.func @transform_1(%arg0: i32) -> (i32, i32) {
    %c0_i32 = arith.constant 0 : i32
    %c0_i32_0 = arith.constant 0 : i32
    return %arg0, %c0_i32 : i32, i32
  }
  func.func @transform_2(%arg0: i32) -> (i32, i32) {
    %c0_i32 = arith.constant 0 : i32
    %c0_i32_0 = arith.constant 0 : i32
    return %arg0, %c0_i32 : i32, i32
  }
}

</mosaic_0001>

<bundles_post_ra>
// kernel: tpu_custom_call.1
= control target key start
LH: loop header
LB: loop body
LE: loop exit
PB: predicated region body
PF: predicated region fallthrough
CT: control target
= control target key end

     0   :  { %7 = vsyncpa [#allocation3], 0  ;;  %s186_s0 = inlined_call_operand.hbm [shape: f32[8,64], index: 0, kind: input, shape index: {}]   ;;  %s187_s1 = inlined_call_operand.hbm [shape: f32[8,64], index: 1, kind: input, shape index: {}]   ;;  %s188_s2 = inlined_call_operand.hbm [shape: f32[8,64], index: 2, kind: output, shape index: {}]  }
   0x1   :  { %8 = vsyncpa [#allocation6], 0 }
   0x2   :  { %9 = vsyncpa [#allocation4], 0  ;;  %s132_s9 = smov [#allocation2]   ;;  %s133_s11 = smov [#allocation5]  }
   0x3   :  { %s16_s10 = sshll.u32 %s132_s9, 4  ;;  %s26_s12 = sshll.u32 %s133_s11, 4  ;;  %s17_s10 = int_to_ptr.vmem [resolvable:$true] %s16_s10  ;;  %s27_s12 = int_to_ptr.vmem [resolvable:$true] %s26_s12 }
   0x4   :  { %s60_s15 = scalar_lea.hbm %s186_s0, 128 }
   0x5   :  { %p61_p0 = scmp.ne.s32.totalorder %s186_s0, %s60_s15  ;;  %p64_p1 = scmp.lt.u32.totalorder %s60_s15, %s186_s0 }
   0x7   :  { %p66_p2 = pnand %p64_p1, %p61_p0 }
   0x9   :  { %69 = shalt.err (!%p66_p2)
}
   0xa   :  { %s70_s20 = scalar_lea.vmem %s17_s10, 128  ;;  %p75_p4 = scmp.lt.s32.totalorder %s17_s10, %s17_s10 }
   0xb   :  { %p71_p3 = scmp.ne.s32.totalorder %s17_s10, %s70_s20  ;;  %p76_p5 = scmp.lt.s32.totalorder %s70_s20, %s70_s20 }
   0xd   :  { %p77_p6 = por %p76_p5, %p75_p4 }
   0xf   :  { %p78_p7 = pnand %p77_p6, %p71_p3 }
  0x11   :  { %81 = shalt.err (!%p78_p7)
}
  0x12   :  { %19 = dma.hbm_to_vmem [thread:$0]  %s186_s0, 128, %s17_s10, [#allocation3]  }
  0x13   :  { %s82_s25 = scalar_lea.hbm %s187_s1, 128 }
  0x14   :  { %p83_p8 = scmp.ne.s32.totalorder %s187_s1, %s82_s25  ;;  %p86_p9 = scmp.lt.u32.totalorder %s82_s25, %s187_s1 }
  0x16   :  { %p88_p10 = pnand %p86_p9, %p83_p8 }
  0x18   :  { %91 = shalt.err (!%p88_p10)
}
  0x19   :  { %s92_s30 = scalar_lea.vmem %s27_s12, 128  ;;  %p97_p12 = scmp.lt.s32.totalorder %s27_s12, %s27_s12 }
  0x1a   :  { %p93_p11 = scmp.ne.s32.totalorder %s27_s12, %s92_s30  ;;  %p98_p13 = scmp.lt.s32.totalorder %s92_s30, %s92_s30 }
  0x1c   :  { %p99_p0 = por %p98_p13, %p97_p12 }
  0x1e   :  { %p100_p1 = pnand %p99_p0, %p93_p11 }
  0x20   :  { %103 = shalt.err (!%p100_p1)
}
  0x21   :  { %29 = dma.hbm_to_vmem [thread:$0]  %s187_s1, 128, %s27_s12, [#allocation6]  }
  0x22   :  { %126 = dma.done.wait [#allocation3], 128  }
  0x23   :  { %127 = vsyncadd [#allocation3], 4294967168 }
  0x24   :  { %128 = dma.done.wait [#allocation6], 128  }
  0x25   :  { %129 = vsyncadd [#allocation6], 4294967168  ;;  %s134_s4 = smov [#allocation7]   ;;  %v36_v0 = vld [vmem:[#allocation2] sm:$0xff]  ;;  %v37_v1 = vld [vmem:[#allocation5] sm:$0xff]  ;;  %vm39_vm0 = vcmask 523264  }
  0x26   :  { %s47_s5 = sshll.u32 %s134_s4, 4  ;;  %v38_v2 = vadd.f32 %v37_v1, %v36_v0  ;;  %s48_s5 = int_to_ptr.vmem [resolvable:$true] %s47_s5 }
  0x27   :  { %s104_s6 = scalar_lea.vmem %s48_s5, 128  ;;  %p109_p3 = scmp.lt.s32.totalorder %s48_s5, %s48_s5 }
  0x28   :  { %40 = vst.msk [vmem:[#allocation7] sm:$0xff] %vm39_vm0, %v38_v2  ;;  %p105_p2 = scmp.ne.s32.totalorder %s48_s5, %s104_s6  ;;  %p110_p4 = scmp.lt.s32.totalorder %s104_s6, %s104_s6 }
  0x2a   :  { %p111_p5 = por %p110_p4, %p109_p3 }
  0x2c   :  { %p112_p6 = pnand %p111_p5, %p105_p2 }
  0x2e   :  { %115 = shalt.err (!%p112_p6)
}
  0x2f   :  { %s116_s8 = scalar_lea.hbm %s188_s2, 128 }
  0x30   :  { %p117_p7 = scmp.ne.s32.totalorder %s188_s2, %s116_s8  ;;  %p120_p8 = scmp.lt.u32.totalorder %s116_s8, %s188_s2 }
  0x32   :  { %p122_p9 = pnand %p120_p8, %p117_p7 }
  0x34   :  { %125 = shalt.err (!%p122_p9)
}
  0x35   :  { %50 = dma.vmem_to_hbm [thread:$0]  %s48_s5, 128, %s188_s2, [#allocation4]  }
  0x36   :  { %130 = dma.done.wait [#allocation4], 128  }
  0x37   :  { %131 = vsyncadd [#allocation4], 4294967168 }
  0x38   :  { %54 = vsyncpa [#allocation3], 1 }
  0x39   :  { %55 = vsyncpa [#allocation6], 1 }
  0x3a   :  { %56 = vsyncpa [#allocation4], 1 }

</bundles_post_ra>
